<compile_context>
chip_gen: v7x
topology: tpu7x:2x2x1
jax: 0.10.0
libtpu: 0.0.40
codegen_flags: <defaults>
</compile_context>

<pallas_src>
import jax
import jax.numpy as jnp
from jax.experimental import pallas as pl
from jax.experimental.pallas import tpu as pltpu

_MAX_LANES = 512          # slab width (multiple of 128)
_MAX_TILE_ROWS = 512      # row tile (multiple of 8)
_VMEM_LIMIT = 32 * 1024 * 1024


def _reduce_kernel(x_ref, m_ref, linv_ref):
    """Online global max + rescaled sum-of-exp across the tiled grid.

    m_ref, linv_ref are (1,1) f32 outputs whose block index is constant, so they
    stay resident in VMEM across grid steps (accumulator pattern).
    """
    i = pl.program_id(0)

    @pl.when(i == 0)
    def _():
        m_ref[...] = jnp.full_like(m_ref, -jnp.inf)
        linv_ref[...] = jnp.zeros_like(linv_ref)

    x = x_ref[...].astype(jnp.float32)
    m_prev = m_ref[...]                                   # (1,1)
    m_new = jnp.maximum(m_prev, jnp.max(x, keepdims=True))
    # Rescale the running sum to the new max, add this tile's sum of exp.
    linv_ref[...] = (linv_ref[...] * jnp.exp(m_prev - m_new)
                     + jnp.sum(jnp.exp(x - m_new), keepdims=True))
    m_ref[...] = m_new

    @pl.when(i == pl.num_programs(0) - 1)
    def _():
        # Exact reciprocal once at finalize (keeps 1e-6 self-test tolerance).
        linv_ref[...] = 1.0 / linv_ref[...]


def _normalize_kernel(m_ref, linv_ref, x_ref, o_ref):
    """out = exp(x - m) * (1/sum), elementwise per tile."""
    x = x_ref[...].astype(jnp.float32)
    e = jnp.exp(x - m_ref[...])          # (1,1) broadcasts over the tile
    o_ref[...] = (e * linv_ref[...]).astype(o_ref.dtype)


def _choose_layout(n):
    """Pick a lane-dense slab (rows_padded, w) and row tile tr for n elements."""
    lane, sub = 128, 8
    w = min(_MAX_LANES, max(lane, pl.cdiv(n, lane) * lane))
    rows = pl.cdiv(n, w)
    tr = min(_MAX_TILE_ROWS, max(sub, pl.cdiv(rows, sub) * sub))
    rows_padded = pl.cdiv(rows, tr) * tr
    return w, tr, rows_padded


def softmax_stable(x: jax.Array) -> jax.Array:
    """Stable softmax over all elements of `x` (matches SoftmaxStable.forward)."""
    orig_shape = x.shape
    orig_dtype = x.dtype
    n = x.size

    # --- layout glue: flatten, pad with -inf, reshape to a lane-dense slab ---
    flat = x.reshape(-1)
    w, tr, rows_p = _choose_layout(n)
    n_pad = rows_p * w
    if n_pad > n:
        flat = jnp.pad(flat, (0, n_pad - n), constant_values=-jnp.inf)
    x2 = flat.reshape(rows_p, w)
    grid = (rows_p // tr,)

    # --- pass 1: tiled online reduction -> global max m and 1/sum_exp ---
    m, linv = pl.pallas_call(
        _reduce_kernel,
        out_shape=(jax.ShapeDtypeStruct((1, 1), jnp.float32),
                   jax.ShapeDtypeStruct((1, 1), jnp.float32)),
        grid=grid,
        in_specs=[pl.BlockSpec((tr, w), lambda i: (i, 0))],
        out_specs=(pl.BlockSpec((1, 1), lambda i: (0, 0)),
                   pl.BlockSpec((1, 1), lambda i: (0, 0))),
        compiler_params=pltpu.CompilerParams(
            dimension_semantics=("arbitrary",),
            vmem_limit_bytes=_VMEM_LIMIT,
        ),
    )(x2)

    # --- pass 2: tiled, parallel normalize ---
    out2 = pl.pallas_call(
        _normalize_kernel,
        out_shape=jax.ShapeDtypeStruct((rows_p, w), orig_dtype),
        grid=grid,
        in_specs=[pl.BlockSpec((1, 1), lambda i: (0, 0)),
                  pl.BlockSpec((1, 1), lambda i: (0, 0)),
                  pl.BlockSpec((tr, w), lambda i: (i, 0))],
        out_specs=pl.BlockSpec((tr, w), lambda i: (i, 0)),
        compiler_params=pltpu.CompilerParams(
            dimension_semantics=("parallel",),
            vmem_limit_bytes=_VMEM_LIMIT,
        ),
    )(m, linv, x2)

    return out2.reshape(-1)[:n].reshape(orig_shape)


def _reference(x):
    c = jnp.max(x)
    e = jnp.exp(x - c)
    return e / jnp.sum(e)


if __name__ == "__main__":
    key = jax.random.PRNGKey(0)
    k1, k2 = jax.random.split(key)

    # Small shape consistent with the module's generic forward: [seq=8, hidden=32]
    x_small = jax.random.normal(k1, (8, 32), dtype=jnp.float32) * 3.0
    y_small = jax.block_until_ready(softmax_stable(x_small))
    ref_small = _reference(x_small)
    assert y_small.shape == x_small.shape and y_small.dtype == x_small.dtype
    assert jnp.allclose(y_small, ref_small, atol=1e-6, rtol=1e-6)
    assert jnp.allclose(jnp.sum(y_small), 1.0, atol=1e-5)

    # Larger shape to exercise the multi-tile online reduction + parallel pass.
    x_large = jax.random.normal(k2, (512, 1024), dtype=jnp.float32) * 5.0
    y_large = jax.block_until_ready(softmax_stable(x_large))
    ref_large = _reference(x_large)
    assert y_large.shape == x_large.shape and y_large.dtype == x_large.dtype
    assert jnp.allclose(y_large, ref_large, atol=1e-8, rtol=1e-5)
    assert jnp.allclose(jnp.sum(y_large), 1.0, atol=1e-4)

    print("KERNEL_OK")
</pallas_src>

<mosaic_0001>
module attributes {stable_mosaic.version = 11 : i64} {
  func.func @_reduce_kernel(%arg0: i32, %arg1: memref<8x256xf32, #tpu.memory_space<vmem>>, %arg2: memref<1x1xf32, #tpu.memory_space<vmem>>, %arg3: memref<1x1xf32, #tpu.memory_space<vmem>>) attributes {dimension_semantics = [#tpu.dimension_semantics<arbitrary>], iteration_bounds = array<i64: 1>, scalar_prefetch = 0 : i64, scratch_operands = 0 : i64, tpu.core_type = #tpu.core_type<tc>, window_params = [{transform_indices = @transform_0, window_bounds = array<i64: 8, 256>}, {pipeline_mode = #tpu.pipeline_mode<synchronous>, transform_indices = @transform_1, window_bounds = array<i64: 1, 1>}, {pipeline_mode = #tpu.pipeline_mode<synchronous>, transform_indices = @transform_2, window_bounds = array<i64: 1, 1>}]} {
    %c0_i32 = arith.constant 0 : i32
    %0 = arith.cmpi eq, %arg0, %c0_i32 : i32
    %1 = arith.extui %0 : i1 to i32
    %c0_i32_0 = arith.constant 0 : i32
    %2 = arith.cmpi ne, %1, %c0_i32_0 : i32
    scf.if %2 {
      %cst_13 = arith.constant 0xFF800000 : f32
      %29 = vector.broadcast %cst_13 : f32 to vector<1x1xf32>
      %c0_14 = arith.constant 0 : index
      %c0_15 = arith.constant 0 : index
      %30 = vector.load %arg2[%c0_14, %c0_15] : memref<1x1xf32, #tpu.memory_space<vmem>>, vector<1x1xf32>
      tpu.vector_store %arg2[%c0_14, %c0_15], %29 {strides = array<i32>} : memref<1x1xf32, #tpu.memory_space<vmem>>, vector<1x1xf32>,
      %cst_16 = arith.constant 0.000000e+00 : f32
      %31 = vector.broadcast %cst_16 : f32 to vector<1x1xf32>
      %c0_17 = arith.constant 0 : index
      %c0_18 = arith.constant 0 : index
      %32 = vector.load %arg3[%c0_17, %c0_18] : memref<1x1xf32, #tpu.memory_space<vmem>>, vector<1x1xf32>
      tpu.vector_store %arg3[%c0_17, %c0_18], %31 {strides = array<i32>} : memref<1x1xf32, #tpu.memory_space<vmem>>, vector<1x1xf32>,
    } else {
    }
    %c0 = arith.constant 0 : index
    %c0_1 = arith.constant 0 : index
    %3 = vector.load %arg1[%c0, %c0_1] : memref<8x256xf32, #tpu.memory_space<vmem>>, vector<8x256xf32>
    %c0_2 = arith.constant 0 : index
    %c0_3 = arith.constant 0 : index
    %4 = vector.load %arg2[%c0_2, %c0_3] : memref<1x1xf32, #tpu.memory_space<vmem>>, vector<1x1xf32>
    %5 = vector.shape_cast %3 : vector<8x256xf32> to vector<1x8x256xf32>
    %cst = arith.constant dense<0xFF800000> : vector<1xf32>
    %6 = vector.multi_reduction <maximumf>, %5, %cst [1, 2] : vector<1x8x256xf32> to vector<1xf32>
    %7 = vector.shape_cast %6 : vector<1xf32> to vector<1x1x1xf32>
    %8 = vector.extract %7[0, 0, 0] : f32 from vector<1x1x1xf32>
    %9 = vector.broadcast %8 : f32 to vector<1x1xf32>
    %10 = arith.maximumf %4, %9 : vector<1x1xf32>
    %c0_4 = arith.constant 0 : index
    %c0_5 = arith.constant 0 : index
    %11 = vector.load %arg3[%c0_4, %c0_5] : memref<1x1xf32, #tpu.memory_space<vmem>>, vector<1x1xf32>
    %12 = arith.subf %4, %10 : vector<1x1xf32>
    %13 = math.exp %12 : vector<1x1xf32>
    %14 = arith.mulf %11, %13 : vector<1x1xf32>
    %15 = vector.broadcast %10 : vector<1x1xf32> to vector<8x256xf32>
    %16 = arith.subf %3, %15 : vector<8x256xf32>
    %17 = math.exp %16 : vector<8x256xf32>
    %18 = vector.shape_cast %17 : vector<8x256xf32> to vector<1x8x256xf32>
    %cst_6 = arith.constant dense<0.000000e+00> : vector<1xf32>
    %19 = vector.multi_reduction <add>, %18, %cst_6 [1, 2] : vector<1x8x256xf32> to vector<1xf32>
    %20 = vector.shape_cast %19 : vector<1xf32> to vector<1x1x1xf32>
    %21 = vector.extract %20[0, 0, 0] : f32 from vector<1x1x1xf32>
    %22 = vector.broadcast %21 : f32 to vector<1x1xf32>
    %23 = arith.addf %14, %22 : vector<1x1xf32>
    %c0_7 = arith.constant 0 : index
    %c0_8 = arith.constant 0 : index
    %24 = vector.load %arg3[%c0_7, %c0_8] : memref<1x1xf32, #tpu.memory_space<vmem>>, vector<1x1xf32>
    tpu.vector_store %arg3[%c0_7, %c0_8], %23 {strides = array<i32>} : memref<1x1xf32, #tpu.memory_space<vmem>>, vector<1x1xf32>,
    %c0_9 = arith.constant 0 : index
    %c0_10 = arith.constant 0 : index
    %25 = vector.load %arg2[%c0_9, %c0_10] : memref<1x1xf32, #tpu.memory_space<vmem>>, vector<1x1xf32>
    tpu.vector_store %arg2[%c0_9, %c0_10], %10 {strides = array<i32>} : memref<1x1xf32, #tpu.memory_space<vmem>>, vector<1x1xf32>,
    %c0_i32_11 = arith.constant 0 : i32
    %26 = arith.cmpi eq, %arg0, %c0_i32_11 : i32
    %27 = arith.extui %26 : i1 to i32
    %c0_i32_12 = arith.constant 0 : i32
    %28 = arith.cmpi ne, %27, %c0_i32_12 : i32
    scf.if %28 {
      %c0_13 = arith.constant 0 : index
      %c0_14 = arith.constant 0 : index
      %29 = vector.load %arg3[%c0_13, %c0_14] : memref<1x1xf32, #tpu.memory_space<vmem>>, vector<1x1xf32>
      %cst_15 = arith.constant 1.000000e+00 : f32
      %30 = vector.broadcast %cst_15 : f32 to vector<1x1xf32>
      %31 = arith.divf %30, %29 : vector<1x1xf32>
      %c0_16 = arith.constant 0 : index
      %c0_17 = arith.constant 0 : index
      %32 = vector.load %arg3[%c0_16, %c0_17] : memref<1x1xf32, #tpu.memory_space<vmem>>, vector<1x1xf32>
      tpu.vector_store %arg3[%c0_16, %c0_17], %31 {strides = array<i32>} : memref<1x1xf32, #tpu.memory_space<vmem>>, vector<1x1xf32>,
    } else {
    }
    return
  }
  func.func @transform_0(%arg0: i32) -> (i32, i32) {
    %c0_i32 = arith.constant 0 : i32
    %c0_i32_0 = arith.constant 0 : i32
    return %arg0, %c0_i32 : i32, i32
  }
  func.func @transform_1(%arg0: i32) -> (i32, i32) {
    %c0_i32 = arith.constant 0 : i32
    %c0_i32_0 = arith.constant 0 : i32
    %c0_i32_1 = arith.constant 0 : i32
    return %c0_i32, %c0_i32_0 : i32, i32
  }
  func.func @transform_2(%arg0: i32) -> (i32, i32) {
    %c0_i32 = arith.constant 0 : i32
    %c0_i32_0 = arith.constant 0 : i32
    %c0_i32_1 = arith.constant 0 : i32
    return %c0_i32, %c0_i32_0 : i32, i32
  }
}

</mosaic_0001>

<bundles_post_ra>
// kernel: tpu_custom_call.1
= control target key start
LH: loop header
LB: loop body
LE: loop exit
PB: predicated region body
PF: predicated region fallthrough
CT: control target
= control target key end

     0   :  { %8 = vsyncpa [#allocation3], 0  ;;  %s270_s0 = inlined_call_operand.hbm [shape: f32[8,256], index: 0, kind: input, shape index: {}]   ;;  %s271_s1 = inlined_call_operand.hbm [shape: f32[1,1], index: 1, kind: output, shape index: {0}]   ;;  %s272_s2 = inlined_call_operand.hbm [shape: f32[1,1], index: 2, kind: output, shape index: {1}]  }
   0x1   :  { %9 = vsyncpa [#allocation4], 0 }
   0x2   :  { %10 = vsyncpa [#allocation7], 0  ;;  %s208_s9 = smov [#allocation2]   ;;  %s136_s13 = scalar_lea.hbm %s270_s0, 256 }
   0x3   :  { %s17_s10 = sshll.u32 %s208_s9, 4  ;;  %p137_p0 = scmp.ne.s32.totalorder %s270_s0, %s136_s13  ;;  %s18_s10 = int_to_ptr.vmem [resolvable:$true] %s17_s10 }
   0x4   :  { %p140_p1 = scmp.lt.u32.totalorder %s136_s13, %s270_s0 }
   0x6   :  { %p142_p2 = pnand %p140_p1, %p137_p0 }
   0x8   :  { %145 = shalt.err (!%p142_p2)
}
   0x9   :  { %s146_s18 = scalar_lea.vmem %s18_s10, 256  ;;  %p151_p4 = scmp.lt.s32.totalorder %s18_s10, %s18_s10 }
   0xa   :  { %p147_p3 = scmp.ne.s32.totalorder %s18_s10, %s146_s18  ;;  %p152_p5 = scmp.lt.s32.totalorder %s146_s18, %s146_s18 }
   0xc   :  { %p153_p6 = por %p152_p5, %p151_p4 }
   0xe   :  { %p154_p7 = pnand %p153_p6, %p147_p3 }
  0x10   :  { %157 = shalt.err (!%p154_p7)
}
  0x11   :  { %20 = dma.hbm_to_vmem [thread:$0]  %s270_s0, 256, %s18_s10, [#allocation3]  }
  0x12   :  { %202 = dma.done.wait [#allocation3], 256  }
  0x13   :  { %203 = vsyncadd [#allocation3], 4294967040  ;;  %vm28_vm0 = vcmask 0   ;;  %v209_v0 = vmov -inf   ;;  %v210_v1 = vmov 0.0   ;;  %v31_v2 = vld [vmem:[#allocation2] sm:$0xff]  ;;  %v52_v13 = vlaneseq }
  0x14   :  { %29 = vst.msk [vmem:[#allocation5] sm:$0x1] %vm28_vm0, %v209_v0  ;;  %30 = vst.msk [vmem:[#allocation6] sm:$0x1] %vm28_vm0, %v210_v1  ;;  %v32_v3 = vld [vmem:[#allocation2 + $0x8] sm:$0xff]  ;;  %v211_v5 = vmov 0  }
  0x15   :  { %v34_v4 = vmax.f32 %v31_v2, %v32_v3  ;;  %127 = vset.pattern.permute.xlu0 %v211_v5  ;;  %v53_v14 = vshrl.u32 %v52_v13, 7  ;;  %s212_s21 = smov [#allocation5]  }
  0x16   :  { %s94_s22 = sshll.u32 %s212_s21, 4  ;;  %s95_s22 = int_to_ptr.vmem [resolvable:$true] %s94_s22 }
  0x17   :  { %35 = vmax.xlane.f32.xlu0 %v34_v4  ;;  %v54_v16 = vsub.s32 0, %v53_v14  ;;  %s158_s23 = scalar_lea.vmem %s95_s22, 16  ;;  %s162_s24 = scalar_lea.vmem %s95_s22, 32 }
  0x18   :  { %p159_p8 = scmp.ne.s32.totalorder %s95_s22, %s158_s23  ;;  %p163_p9 = scmp.lt.s32.totalorder %s95_s22, %s95_s22 }
  0x19   :  { %p164_p10 = scmp.lt.s32.totalorder %s162_s24, %s158_s23 }
  0x1b   :  { %v33_v15 = vld [vmem:[#allocation5] sm:$0x1]  ;;  %p165_p11 = por %p164_p10, %p163_p9 }
  0x1d   :  { %p166_p12 = pnand %p165_p11, %p159_p8 }
  0xa4   :  { %v36_v6 = vpop.xlane.xlu0 %35 }
  0xa5   :  { %v37_v7 = vrot.slane %v36_v6, 4 }
  0xa7   :  { %v38_v8 = vmax.f32 %v36_v6, %v37_v7 }
  0xa9   :  { %v39_v9 = vrot.slane %v38_v8, 2 }
  0xab   :  { %v40_v10 = vmax.f32 %v38_v8, %v39_v9 }
  0xad   :  { %v41_v11 = vrot.slane %v40_v10, 1 }
  0xaf   :  { %v42_v12 = vmax.f32 %v40_v10, %v41_v11 }
  0xb1   :  { %117 = vpush %v42_v12 }
  0xe2   :  { %s118_s0 = spop %117 }
  0xe3   :  { %v44_v17 = vstv %s118_s0 }
  0xe4   :  { %v45_v18 = vmax.f32 %v33_v15, %v44_v17 }
  0xe6   :  { %v47_v19 = vsub.f32 %v33_v15, %v45_v18  ;;  %80 = vst.msk [vmem:[#allocation5] sm:$0x1] %vm28_vm0, %v45_v18  ;;  %v55_v20 = vrot.slane %v45_v18, %v54_v16 }
  0xe8   :  { %57 = vperm.xlu0 %127, %v55_v20  }
 0x167   :  { %v58_v21 = vpop.permute.xlu0 %57 }
 0x168   :  { %v60_v22 = vsub.f32 %v31_v2, %v58_v21  ;;  %v61_v23 = vsub.f32 %v32_v3, %v58_v21 }
 0x16a   :  { %v62_v24 = vmul.f32 1.442695, %v60_v22  ;;  %v64_v25 = vmul.f32 1.442695, %v61_v23 }
 0x16c   :  { %128 = vpow2.f32 %v62_v24 }
 0x16d   :  { %130 = vpow2.f32 %v64_v25 }
 0x176   :  { %v129_v26 = vpop.eup %128 }
 0x177   :  { %v131_v27 = vpop.eup %130 }
 0x178   :  { %v66_v28 = vadd.f32 %v131_v27, %v129_v26 }
 0x17a   :  { %67 = vadd.xlane.f32.xlu1 %v66_v28 }
 0x17b   :  { %169 = shalt.err (!%p166_p12)
}
 0x17c   :  { %s170_s27 = scalar_lea.hbm %s271_s1, 16 }
 0x17d   :  { %p171_p13 = scmp.ne.s32.totalorder %s271_s1, %s170_s27  ;;  %p174_p0 = scmp.lt.u32.totalorder %s170_s27, %s271_s1 }
 0x17f   :  { %p176_p1 = pnand %p174_p0, %p171_p13 }
 0x181   :  { %179 = shalt.err (!%p176_p1)
}
 0x182   :  { %97 = dma.vmem_to_hbm [thread:$0]  %s95_s22, 16, %s271_s1, [#allocation4]   ;;  %v48_v36 = vmul.f32 1.442695, %v47_v19  ;;  %v46_v38 = vld [vmem:[#allocation6] sm:$0x1] }
 0x183   :  { %s213_s1 = smov [#allocation6]  }
 0x184   :  { %132 = vpow2.f32 %v48_v36  ;;  %s104_s7 = sshll.u32 %s213_s1, 4  ;;  %s105_s7 = int_to_ptr.vmem [resolvable:$true] %s104_s7 }
 0x185   :  { %s180_s8 = scalar_lea.vmem %s105_s7, 16  ;;  %s184_s9 = scalar_lea.vmem %s105_s7, 32 }
 0x186   :  { %p181_p2 = scmp.ne.s32.totalorder %s105_s7, %s180_s8  ;;  %p185_p3 = scmp.lt.s32.totalorder %s105_s7, %s105_s7 }
 0x187   :  { %p186_p4 = scmp.lt.s32.totalorder %s184_s9, %s180_s8 }
 0x189   :  { %p187_p5 = por %p186_p4, %p185_p3 }
 0x18b   :  { %p188_p6 = pnand %p187_p5, %p181_p2 }
 0x18e   :  { %v133_v37 = vpop.eup %132 }
 0x18f   :  { %v50_v39 = vmul.f32 %v133_v37, %v46_v38 }
 0x207   :  { %v68_v29 = vpop.xlane.xlu1 %67 }
 0x208   :  { %v69_v30 = vrot.slane %v68_v29, 4 }
 0x20a   :  { %v70_v31 = vadd.f32 %v69_v30, %v68_v29 }
 0x20c   :  { %v71_v32 = vrot.slane %v70_v31, 2 }
 0x20e   :  { %v72_v33 = vadd.f32 %v71_v32, %v70_v31 }
 0x210   :  { %v73_v34 = vrot.slane %v72_v33, 1 }
 0x212   :  { %v74_v35 = vadd.f32 %v73_v34, %v72_v33 }
 0x214   :  { %119 = vpush %v74_v35 }
 0x245   :  { %s120_s6 = spop %119 }
 0x246   :  { %v76_v40 = vstv %s120_s6 }
 0x247   :  { %v77_v41 = vadd.f32 %v76_v40, %v50_v39 }
 0x249   :  { %79 = vst.msk [vmem:[#allocation6] sm:$0x1] %vm28_vm0, %v77_v41 }
 0x250   :  { %v84_v42 = vld [vmem:[#allocation6] sm:$0x1] }
 0x251   :  { %134 = vrcp.f32 %v84_v42 }
 0x25b   :  { %v135_v43 = vpop.eup %134 }
 0x25c   :  { %87 = vst.msk [vmem:[#allocation6] sm:$0x1] %vm28_vm0, %v135_v43 }
 0x25d   :  { %191 = shalt.err (!%p188_p6)
}
 0x25e   :  { %s192_s12 = scalar_lea.hbm %s272_s2, 16 }
 0x25f   :  { %p193_p7 = scmp.ne.s32.totalorder %s272_s2, %s192_s12  ;;  %p196_p8 = scmp.lt.u32.totalorder %s192_s12, %s272_s2 }
 0x261   :  { %p198_p9 = pnand %p196_p8, %p193_p7 }
 0x263   :  { %201 = shalt.err (!%p198_p9)
}
 0x264   :  { %107 = dma.vmem_to_hbm [thread:$0]  %s105_s7, 16, %s272_s2, [#allocation7]  }
 0x265   :  { %204 = dma.done.wait [#allocation4], 16  }
 0x266   :  { %205 = vsyncadd [#allocation4], 4294967280 }
 0x267   :  { %206 = dma.done.wait [#allocation7], 16  }
 0x268   :  { %207 = vsyncadd [#allocation7], 4294967280 }
 0x269   :  { %114 = vsyncpa [#allocation3], 1 }
 0x26a   :  { %115 = vsyncpa [#allocation4], 1 }
 0x26b   :  { %116 = vsyncpa [#allocation7], 1 }

</bundles_post_ra>
